<compile_context>
chip_gen: v7x
topology: tpu7x:2x2x1
jax: 0.10.0
libtpu: 0.0.40
codegen_flags: <defaults>
</compile_context>

<pallas_src>
import functools

import jax
import jax.numpy as jnp
from jax.experimental import pallas as pl
from jax.experimental.pallas import tpu as pltpu


def _cross_attention_kernel(x_ref, ctx_ref, wq_ref, wkv_ref, wo_ref, bo_ref,
                            out_ref, *, heads, dim_head):
    """Fused cross-attention for one (batch, query-tile) grid cell.

    All TN-scaled tensors keep the token axis (TN = tile_n, multiple of 128)
    on lanes; channels / context tokens live on sublanes.

      x_ref   : (1, C, TN)        bf16  flattened NCHW pixels (1x1 conv == per-pixel linear)
      ctx_ref : (1, T, Cc)        bf16  context tokens
      wq_ref  : (hidden, C)       bf16  to_q conv weight (softmax scale pre-folded)
      wkv_ref : (Cc, 2*hidden)    bf16  to_kv linear weight, transposed
      wo_ref  : (C_out, hidden)   bf16  to_out conv weight
      bo_ref  : (C_out, 1)        f32   to_out bias
      out_ref : (1, C_out, TN)    f32
    """
    hidden = heads * dim_head

    x = x_ref[0]                       # (C, TN)   lane-dense
    ctx = ctx_ref[0]                   # (T, Cc)
    wo = wo_ref[...]                   # (C_out, hidden)

    # Q projection, kept transposed: q^T = Wq @ x -> (hidden, TN).
    qT = jnp.dot(wq_ref[...], x,
                 preferred_element_type=jnp.float32).astype(jnp.bfloat16)

    # KV projection (tiny: T x Cc x 2*hidden matmul).
    # TODO(synk): hoist to per-batch VMEM scratch (pl.when(program_id(1)==0))
    # once context length / context_dim grow enough for the recompute to matter.
    kv = jnp.dot(ctx, wkv_ref[...], preferred_element_type=jnp.float32)  # (T, 2*hidden)
    k = kv[:, :hidden].astype(jnp.bfloat16)    # (T, hidden)
    v = kv[:, hidden:].astype(jnp.bfloat16)    # (T, hidden)

    p_parts = []        # per-head normalized attention, transposed: (T, TN)
    vw_parts = []       # per-head Wo-folded values:                 (C_out, T)
    for h in range(heads):                                  # static unroll
        lo = h * dim_head
        qh = qT[lo:lo + dim_head, :]                        # (Dh, TN)
        kh = k[:, lo:lo + dim_head]                         # (T, Dh)
        vh = v[:, lo:lo + dim_head]                         # (T, Dh)

        # sim^T = K_h @ Q_h^T -> (T, TN); softmax over the context (sublane) axis.
        sim = jnp.dot(kh, qh, preferred_element_type=jnp.float32)
        m = jnp.max(sim, axis=0, keepdims=True)             # (1, TN)
        p = jnp.exp(sim - m)                                # (T, TN)
        denom = jnp.sum(p, axis=0, keepdims=True)           # (1, TN)
        p_parts.append(p * pl.reciprocal(denom, approx=True))

        # Fold Wo into V: (attn_h @ v_h) @ Wo_h == attn_h @ (v_h @ Wo_h).
        # Computed transposed: Wo_h @ v_h^T -> (C_out, T).
        vw_parts.append(
            jax.lax.dot_general(wo[:, lo:lo + dim_head], vh,
                                (((1,), (1,)), ((), ())),
                                preferred_element_type=jnp.float32))

    # Batched epilogue: one K = heads*T contraction instead of `heads` K=T dots.
    P = jnp.concatenate(p_parts, axis=0)      # (heads*T, TN)    f32
    VW = jnp.concatenate(vw_parts, axis=1)    # (C_out, heads*T) f32
    outT = jnp.dot(VW, P, preferred_element_type=jnp.float32)   # (C_out, TN)
    out_ref[0] = (outT + bo_ref[...]).astype(out_ref.dtype)


def _pick_tile_n(n):
    """Largest lane-dense (multiple-of-128) divisor of n with >=2 tiles."""
    for t in (512, 384, 256, 128):
        if n % t == 0 and n // t >= 2:
            return t
    for t in (512, 384, 256, 128):
        if n % t == 0:
            return t
    return n


def cross_attention(x, context, wq, wkv_t, wo, bo, *, heads, dim_head,
                    tile_n=None):
    """Pallas TPU CrossAttention forward.

    x       : (B, C, H, W)            image features (NCHW, as in PyTorch)
    context : (B, T, Cc)              context tokens
    wq      : (heads*dim_head, C)     to_q   Conv2d weight (squeezed)
    wkv_t   : (Cc, 2*heads*dim_head)  to_kv  Linear weight, transposed
    wo      : (C, heads*dim_head)     to_out Conv2d weight (squeezed)
    bo      : (C,)                    to_out bias
    returns : (B, C, H, W)
    """
    B, C, H, W = x.shape
    T, Cc = context.shape[1], context.shape[2]
    hidden = heads * dim_head
    C_out = wo.shape[0]
    N = H * W
    scale = float(dim_head) ** -0.5

    if tile_n is None:
        tile_n = _pick_tile_n(N)
    assert N % tile_n == 0, "spatial tokens must divide the query tile"

    cdt = jnp.bfloat16
    # NCHW is consumed directly: reshape only, no HBM transpose round trip.
    x_seq = x.reshape(B, C, N).astype(cdt)          # (B, C, N)
    ctx = context.astype(cdt)                       # (B, T, Cc)
    wq_s = (wq * scale).astype(cdt)                 # fold softmax scale into Wq
    wkv_c = wkv_t.astype(cdt)
    wo_c = wo.astype(cdt)
    bo2 = bo.reshape(C_out, 1).astype(jnp.float32)

    kernel = functools.partial(_cross_attention_kernel,
                               heads=heads, dim_head=dim_head)

    out = pl.pallas_call(
        kernel,
        out_shape=jax.ShapeDtypeStruct((B, C_out, N), jnp.float32),
        grid=(B, N // tile_n),
        in_specs=[
            pl.BlockSpec((1, C, tile_n), lambda b, i: (b, 0, i)),
            pl.BlockSpec((1, T, Cc), lambda b, i: (b, 0, 0)),
            pl.BlockSpec((hidden, C), lambda b, i: (0, 0)),
            pl.BlockSpec((Cc, 2 * hidden), lambda b, i: (0, 0)),
            pl.BlockSpec((C_out, hidden), lambda b, i: (0, 0)),
            pl.BlockSpec((C_out, 1), lambda b, i: (0, 0)),
        ],
        out_specs=pl.BlockSpec((1, C_out, tile_n), lambda b, i: (b, 0, i)),
        compiler_params=pltpu.CompilerParams(
            dimension_semantics=("parallel", "parallel")),
    )(x_seq, ctx, wq_s, wkv_c, wo_c, bo2)

    # (B, C_out, N) -> (B, C_out, H, W): reshape only, no transpose.
    return out.reshape(B, C_out, H, W)


def _reference(x, context, wq, wkv_t, wo, bo, *, heads, dim_head):
    """Pure-JAX (f32) mirror of the PyTorch CrossAttention forward."""
    B, C, H, W = x.shape
    hidden = heads * dim_head
    scale = float(dim_head) ** -0.5
    N = H * W
    xs = x.reshape(B, C, N).transpose(0, 2, 1)                  # (B, N, C)
    q = (xs @ wq.T) * scale                                     # (B, N, hidden)
    kv = context @ wkv_t                                        # (B, T, 2*hidden)
    k, v = kv[..., :hidden], kv[..., hidden:]
    qh = q.reshape(B, N, heads, dim_head)
    kh = k.reshape(B, -1, heads, dim_head)
    vh = v.reshape(B, -1, heads, dim_head)
    sim = jnp.einsum('bnhd,bthd->bhnt', qh, kh)
    attn = jax.nn.softmax(sim, axis=-1)
    o = jnp.einsum('bhnt,bthd->bnhd', attn, vh).reshape(B, N, hidden)
    o = o @ wo.T + bo                                           # (B, N, C)
    return o.transpose(0, 2, 1).reshape(B, C, H, W)


if __name__ == "__main__":
    key = jax.random.PRNGKey(0)
    B, C, H, W = 2, 8, 16, 16          # dim = 8 channels
    heads, dim_head = 4, 32            # hidden = 128 (lane-dense)
    hidden = heads * dim_head
    T, Cc = 8, 16                      # context: 8 tokens, context_dim = 16

    k0, k1, k2, k3, k4, k5 = jax.random.split(key, 6)
    x = jax.random.normal(k0, (B, C, H, W), dtype=jnp.float32)
    context = jax.random.normal(k1, (B, T, Cc), dtype=jnp.float32)
    wq = jax.random.normal(k2, (hidden, C), dtype=jnp.float32) * (C ** -0.5)
    wkv_t = jax.random.normal(k3, (Cc, 2 * hidden), dtype=jnp.float32) * (Cc ** -0.5)
    wo = jax.random.normal(k4, (C, hidden), dtype=jnp.float32) * (hidden ** -0.5)
    bo = jax.random.normal(k5, (C,), dtype=jnp.float32) * 0.1

    out = cross_attention(x, context, wq, wkv_t, wo, bo,
                          heads=heads, dim_head=dim_head)
    out = jax.block_until_ready(out)

    ref = _reference(x, context, wq, wkv_t, wo, bo,
                     heads=heads, dim_head=dim_head)
    assert out.shape == (B, C, H, W)
    # Tolerance covers bf16 inputs + default-precision (bf16-pass) MXU matmuls
    # on the reference side as well.
    assert jnp.allclose(out, ref, atol=2e-2, rtol=2e-2), \
        float(jnp.max(jnp.abs(out - ref)))
    print("KERNEL_OK")
</pallas_src>

<mosaic_0001>
module attributes {stable_mosaic.version = 11 : i64} {
  func.func @_cross_attention_kernel(%arg0: i32, %arg1: i32, %arg2: memref<1x8x128xbf16, #tpu.memory_space<vmem>>, %arg3: memref<1x8x16xbf16, #tpu.memory_space<vmem>>, %arg4: memref<128x8xbf16, #tpu.memory_space<vmem>>, %arg5: memref<16x256xbf16, #tpu.memory_space<vmem>>, %arg6: memref<8x128xbf16, #tpu.memory_space<vmem>>, %arg7: memref<8x1xf32, #tpu.memory_space<vmem>>, %arg8: memref<1x8x128xf32, #tpu.memory_space<vmem>>) attributes {dimension_semantics = [#tpu.dimension_semantics<parallel>, #tpu.dimension_semantics<parallel>], iteration_bounds = array<i64: 2, 2>, scalar_prefetch = 0 : i64, scratch_operands = 0 : i64, tpu.core_type = #tpu.core_type<tc>, window_params = [{transform_indices = @transform_0, window_bounds = array<i64: 1, 8, 128>}, {transform_indices = @transform_1, window_bounds = array<i64: 1, 8, 16>}, {pipeline_mode = #tpu.pipeline_mode<synchronous>, transform_indices = @transform_2, window_bounds = array<i64: 128, 8>}, {pipeline_mode = #tpu.pipeline_mode<synchronous>, transform_indices = @transform_3, window_bounds = array<i64: 16, 256>}, {pipeline_mode = #tpu.pipeline_mode<synchronous>, transform_indices = @transform_4, window_bounds = array<i64: 8, 128>}, {pipeline_mode = #tpu.pipeline_mode<synchronous>, transform_indices = @transform_5, window_bounds = array<i64: 8, 1>}, {transform_indices = @transform_6, window_bounds = array<i64: 1, 8, 128>}]} {
    %c0 = arith.constant 0 : index
    %c0_0 = arith.constant 0 : index
    %c0_1 = arith.constant 0 : index
    %0 = vector.load %arg2[%c0, %c0_0, %c0_1] : memref<1x8x128xbf16, #tpu.memory_space<vmem>>, vector<1x8x128xbf16>
    %1 = vector.shape_cast %0 : vector<1x8x128xbf16> to vector<8x128xbf16>
    %c0_2 = arith.constant 0 : index
    %c0_3 = arith.constant 0 : index
    %c0_4 = arith.constant 0 : index
    %2 = vector.load %arg3[%c0_2, %c0_3, %c0_4] : memref<1x8x16xbf16, #tpu.memory_space<vmem>>, vector<1x8x16xbf16>
    %3 = vector.shape_cast %2 : vector<1x8x16xbf16> to vector<8x16xbf16>
    %c0_5 = arith.constant 0 : index
    %c0_6 = arith.constant 0 : index
    %4 = vector.load %arg6[%c0_5, %c0_6] : memref<8x128xbf16, #tpu.memory_space<vmem>>, vector<8x128xbf16>
    %c0_7 = arith.constant 0 : index
    %c0_8 = arith.constant 0 : index
    %5 = vector.load %arg4[%c0_7, %c0_8] : memref<128x8xbf16, #tpu.memory_space<vmem>>, vector<128x8xbf16>
    %cst = arith.constant dense<0.000000e+00> : vector<128x128xf32>
    %6 = tpu.matmul %5, %1, %cst {dimension_numbers = #tpu.dot_dimension_numbers<[1], [0], [0], [1], [0, 0, 1, 1], [], []>} : vector<128x8xbf16>, vector<8x128xbf16>, vector<128x128xf32> -> vector<128x128xf32>
    %7 = arith.truncf %6 : vector<128x128xf32> to vector<128x128xbf16>
    %c0_9 = arith.constant 0 : index
    %c0_10 = arith.constant 0 : index
    %8 = vector.load %arg5[%c0_9, %c0_10] : memref<16x256xbf16, #tpu.memory_space<vmem>>, vector<16x256xbf16>
    %cst_11 = arith.constant dense<0.000000e+00> : vector<8x256xf32>
    %9 = tpu.matmul %3, %8, %cst_11 {dimension_numbers = #tpu.dot_dimension_numbers<[1], [0], [0], [1], [0, 0, 1, 1], [], []>} : vector<8x16xbf16>, vector<16x256xbf16>, vector<8x256xf32> -> vector<8x256xf32>
    %10 = vector.extract_strided_slice %9 {offsets = [0, 0], sizes = [8, 128], strides = [1, 1]} : vector<8x256xf32> to vector<8x128xf32>
    %11 = arith.truncf %10 : vector<8x128xf32> to vector<8x128xbf16>
    %12 = vector.extract_strided_slice %9 {offsets = [0, 128], sizes = [8, 128], strides = [1, 1]} : vector<8x256xf32> to vector<8x128xf32>
    %13 = arith.truncf %12 : vector<8x128xf32> to vector<8x128xbf16>
    %14 = vector.extract_strided_slice %7 {offsets = [0, 0], sizes = [32, 128], strides = [1, 1]} : vector<128x128xbf16> to vector<32x128xbf16>
    %15 = vector.extract_strided_slice %11 {offsets = [0, 0], sizes = [8, 32], strides = [1, 1]} : vector<8x128xbf16> to vector<8x32xbf16>
    %16 = vector.extract_strided_slice %13 {offsets = [0, 0], sizes = [8, 32], strides = [1, 1]} : vector<8x128xbf16> to vector<8x32xbf16>
    %cst_12 = arith.constant dense<0.000000e+00> : vector<8x128xf32>
    %17 = tpu.matmul %15, %14, %cst_12 {dimension_numbers = #tpu.dot_dimension_numbers<[1], [0], [0], [1], [0, 0, 1, 1], [], []>} : vector<8x32xbf16>, vector<32x128xbf16>, vector<8x128xf32> -> vector<8x128xf32>
    %cst_13 = arith.constant dense<0xFF800000> : vector<128xf32>
    %18 = vector.multi_reduction <maximumf>, %17, %cst_13 [0] : vector<8x128xf32> to vector<128xf32>
    %19 = vector.shape_cast %18 : vector<128xf32> to vector<1x128xf32>
    %20 = vector.broadcast %19 : vector<1x128xf32> to vector<8x128xf32>
    %21 = arith.subf %17, %20 : vector<8x128xf32>
    %22 = math.exp %21 : vector<8x128xf32>
    %cst_14 = arith.constant dense<0.000000e+00> : vector<128xf32>
    %23 = vector.multi_reduction <add>, %22, %cst_14 [0] : vector<8x128xf32> to vector<128xf32>
    %24 = vector.shape_cast %23 : vector<128xf32> to vector<1x128xf32>
    %25 = tpu.reciprocal %24 {approx = true} : vector<1x128xf32> -> vector<1x128xf32>
    %26 = vector.broadcast %25 : vector<1x128xf32> to vector<8x128xf32>
    %27 = arith.mulf %22, %26 : vector<8x128xf32>
    %28 = vector.extract_strided_slice %4 {offsets = [0, 0], sizes = [8, 32], strides = [1, 1]} : vector<8x128xbf16> to vector<8x32xbf16>
    %cst_15 = arith.constant dense<0.000000e+00> : vector<8x8xf32>
    %29 = tpu.matmul %28, %16, %cst_15 {dimension_numbers = #tpu.dot_dimension_numbers<[1], [1], [0], [0], [0, 0, 1, 0], [], []>} : vector<8x32xbf16>, vector<8x32xbf16>, vector<8x8xf32> -> vector<8x8xf32>
    %30 = vector.extract_strided_slice %7 {offsets = [32, 0], sizes = [32, 128], strides = [1, 1]} : vector<128x128xbf16> to vector<32x128xbf16>
    %31 = vector.extract_strided_slice %11 {offsets = [0, 32], sizes = [8, 32], strides = [1, 1]} : vector<8x128xbf16> to vector<8x32xbf16>
    %32 = vector.extract_strided_slice %13 {offsets = [0, 32], sizes = [8, 32], strides = [1, 1]} : vector<8x128xbf16> to vector<8x32xbf16>
    %cst_16 = arith.constant dense<0.000000e+00> : vector<8x128xf32>
    %33 = tpu.matmul %31, %30, %cst_16 {dimension_numbers = #tpu.dot_dimension_numbers<[1], [0], [0], [1], [0, 0, 1, 1], [], []>} : vector<8x32xbf16>, vector<32x128xbf16>, vector<8x128xf32> -> vector<8x128xf32>
    %cst_17 = arith.constant dense<0xFF800000> : vector<128xf32>
    %34 = vector.multi_reduction <maximumf>, %33, %cst_17 [0] : vector<8x128xf32> to vector<128xf32>
    %35 = vector.shape_cast %34 : vector<128xf32> to vector<1x128xf32>
    %36 = vector.broadcast %35 : vector<1x128xf32> to vector<8x128xf32>
    %37 = arith.subf %33, %36 : vector<8x128xf32>
    %38 = math.exp %37 : vector<8x128xf32>
    %cst_18 = arith.constant dense<0.000000e+00> : vector<128xf32>
    %39 = vector.multi_reduction <add>, %38, %cst_18 [0] : vector<8x128xf32> to vector<128xf32>
    %40 = vector.shape_cast %39 : vector<128xf32> to vector<1x128xf32>
    %41 = tpu.reciprocal %40 {approx = true} : vector<1x128xf32> -> vector<1x128xf32>
    %42 = vector.broadcast %41 : vector<1x128xf32> to vector<8x128xf32>
    %43 = arith.mulf %38, %42 : vector<8x128xf32>
    %44 = vector.extract_strided_slice %4 {offsets = [0, 32], sizes = [8, 32], strides = [1, 1]} : vector<8x128xbf16> to vector<8x32xbf16>
    %cst_19 = arith.constant dense<0.000000e+00> : vector<8x8xf32>
    %45 = tpu.matmul %44, %32, %cst_19 {dimension_numbers = #tpu.dot_dimension_numbers<[1], [1], [0], [0], [0, 0, 1, 0], [], []>} : vector<8x32xbf16>, vector<8x32xbf16>, vector<8x8xf32> -> vector<8x8xf32>
    %46 = vector.extract_strided_slice %7 {offsets = [64, 0], sizes = [32, 128], strides = [1, 1]} : vector<128x128xbf16> to vector<32x128xbf16>
    %47 = vector.extract_strided_slice %11 {offsets = [0, 64], sizes = [8, 32], strides = [1, 1]} : vector<8x128xbf16> to vector<8x32xbf16>
    %48 = vector.extract_strided_slice %13 {offsets = [0, 64], sizes = [8, 32], strides = [1, 1]} : vector<8x128xbf16> to vector<8x32xbf16>
    %cst_20 = arith.constant dense<0.000000e+00> : vector<8x128xf32>
    %49 = tpu.matmul %47, %46, %cst_20 {dimension_numbers = #tpu.dot_dimension_numbers<[1], [0], [0], [1], [0, 0, 1, 1], [], []>} : vector<8x32xbf16>, vector<32x128xbf16>, vector<8x128xf32> -> vector<8x128xf32>
    %cst_21 = arith.constant dense<0xFF800000> : vector<128xf32>
    %50 = vector.multi_reduction <maximumf>, %49, %cst_21 [0] : vector<8x128xf32> to vector<128xf32>
    %51 = vector.shape_cast %50 : vector<128xf32> to vector<1x128xf32>
    %52 = vector.broadcast %51 : vector<1x128xf32> to vector<8x128xf32>
    %53 = arith.subf %49, %52 : vector<8x128xf32>
    %54 = math.exp %53 : vector<8x128xf32>
    %cst_22 = arith.constant dense<0.000000e+00> : vector<128xf32>
    %55 = vector.multi_reduction <add>, %54, %cst_22 [0] : vector<8x128xf32> to vector<128xf32>
    %56 = vector.shape_cast %55 : vector<128xf32> to vector<1x128xf32>
    %57 = tpu.reciprocal %56 {approx = true} : vector<1x128xf32> -> vector<1x128xf32>
    %58 = vector.broadcast %57 : vector<1x128xf32> to vector<8x128xf32>
    %59 = arith.mulf %54, %58 : vector<8x128xf32>
    %60 = vector.extract_strided_slice %4 {offsets = [0, 64], sizes = [8, 32], strides = [1, 1]} : vector<8x128xbf16> to vector<8x32xbf16>
    %cst_23 = arith.constant dense<0.000000e+00> : vector<8x8xf32>
    %61 = tpu.matmul %60, %48, %cst_23 {dimension_numbers = #tpu.dot_dimension_numbers<[1], [1], [0], [0], [0, 0, 1, 0], [], []>} : vector<8x32xbf16>, vector<8x32xbf16>, vector<8x8xf32> -> vector<8x8xf32>
    %62 = vector.extract_strided_slice %7 {offsets = [96, 0], sizes = [32, 128], strides = [1, 1]} : vector<128x128xbf16> to vector<32x128xbf16>
    %63 = vector.extract_strided_slice %11 {offsets = [0, 96], sizes = [8, 32], strides = [1, 1]} : vector<8x128xbf16> to vector<8x32xbf16>
    %64 = vector.extract_strided_slice %13 {offsets = [0, 96], sizes = [8, 32], strides = [1, 1]} : vector<8x128xbf16> to vector<8x32xbf16>
    %cst_24 = arith.constant dense<0.000000e+00> : vector<8x128xf32>
    %65 = tpu.matmul %63, %62, %cst_24 {dimension_numbers = #tpu.dot_dimension_numbers<[1], [0], [0], [1], [0, 0, 1, 1], [], []>} : vector<8x32xbf16>, vector<32x128xbf16>, vector<8x128xf32> -> vector<8x128xf32>
    %cst_25 = arith.constant dense<0xFF800000> : vector<128xf32>
    %66 = vector.multi_reduction <maximumf>, %65, %cst_25 [0] : vector<8x128xf32> to vector<128xf32>
    %67 = vector.shape_cast %66 : vector<128xf32> to vector<1x128xf32>
    %68 = vector.broadcast %67 : vector<1x128xf32> to vector<8x128xf32>
    %69 = arith.subf %65, %68 : vector<8x128xf32>
    %70 = math.exp %69 : vector<8x128xf32>
    %cst_26 = arith.constant dense<0.000000e+00> : vector<128xf32>
    %71 = vector.multi_reduction <add>, %70, %cst_26 [0] : vector<8x128xf32> to vector<128xf32>
    %72 = vector.shape_cast %71 : vector<128xf32> to vector<1x128xf32>
    %73 = tpu.reciprocal %72 {approx = true} : vector<1x128xf32> -> vector<1x128xf32>
    %74 = vector.broadcast %73 : vector<1x128xf32> to vector<8x128xf32>
    %75 = arith.mulf %70, %74 : vector<8x128xf32>
    %76 = vector.extract_strided_slice %4 {offsets = [0, 96], sizes = [8, 32], strides = [1, 1]} : vector<8x128xbf16> to vector<8x32xbf16>
    %cst_27 = arith.constant dense<0.000000e+00> : vector<8x8xf32>
    %77 = tpu.matmul %76, %64, %cst_27 {dimension_numbers = #tpu.dot_dimension_numbers<[1], [1], [0], [0], [0, 0, 1, 0], [], []>} : vector<8x32xbf16>, vector<8x32xbf16>, vector<8x8xf32> -> vector<8x8xf32>
    %78 = tpu.concatenate %27, %43, %59, %75 in 0 : vector<8x128xf32>, vector<8x128xf32>, vector<8x128xf32>, vector<8x128xf32> -> vector<32x128xf32>
    %79 = tpu.concatenate %29, %45, %61, %77 in 1 : vector<8x8xf32>, vector<8x8xf32>, vector<8x8xf32>, vector<8x8xf32> -> vector<8x32xf32>
    %cst_28 = arith.constant dense<0.000000e+00> : vector<8x128xf32>
    %80 = tpu.matmul %79, %78, %cst_28 {dimension_numbers = #tpu.dot_dimension_numbers<[1], [0], [0], [1], [0, 0, 1, 1], [], []>} : vector<8x32xf32>, vector<32x128xf32>, vector<8x128xf32> -> vector<8x128xf32>
    %c0_29 = arith.constant 0 : index
    %c0_30 = arith.constant 0 : index
    %81 = vector.load %arg7[%c0_29, %c0_30] : memref<8x1xf32, #tpu.memory_space<vmem>>, vector<8x1xf32>
    %82 = vector.broadcast %81 : vector<8x1xf32> to vector<8x128xf32>
    %83 = arith.addf %80, %82 : vector<8x128xf32>
    %c0_31 = arith.constant 0 : index
    %c0_32 = arith.constant 0 : index
    %c0_33 = arith.constant 0 : index
    %84 = vector.load %arg8[%c0_31, %c0_32, %c0_33] : memref<1x8x128xf32, #tpu.memory_space<vmem>>, vector<1x8x128xf32>
    %85 = vector.shape_cast %84 : vector<1x8x128xf32> to vector<8x128xf32>
    %86 = vector.shape_cast %83 : vector<8x128xf32> to vector<1x8x128xf32>
    tpu.vector_store %arg8[%c0_31, %c0_32, %c0_33], %86 {strides = array<i32>} : memref<1x8x128xf32, #tpu.memory_space<vmem>>, vector<1x8x128xf32>,
    return
  }
  func.func @transform_0(%arg0: i32, %arg1: i32) -> (i32, i32, i32) {
    %c0_i32 = arith.constant 0 : i32
    %c0_i32_0 = arith.constant 0 : i32
    return %arg0, %c0_i32, %arg1 : i32, i32, i32
  }
  func.func @transform_1(%arg0: i32, %arg1: i32) -> (i32, i32, i32) {
    %c0_i32 = arith.constant 0 : i32
    %c0_i32_0 = arith.constant 0 : i32
    %c0_i32_1 = arith.constant 0 : i32
    return %arg0, %c0_i32, %c0_i32_0 : i32, i32, i32
  }
  func.func @transform_2(%arg0: i32, %arg1: i32) -> (i32, i32) {
    %c0_i32 = arith.constant 0 : i32
    %c0_i32_0 = arith.constant 0 : i32
    %c0_i32_1 = arith.constant 0 : i32
    return %c0_i32, %c0_i32_0 : i32, i32
  }
  func.func @transform_3(%arg0: i32, %arg1: i32) -> (i32, i32) {
    %c0_i32 = arith.constant 0 : i32
    %c0_i32_0 = arith.constant 0 : i32
    %c0_i32_1 = arith.constant 0 : i32
    return %c0_i32, %c0_i32_0 : i32, i32
  }
  func.func @transform_4(%arg0: i32, %arg1: i32) -> (i32, i32) {
    %c0_i32 = arith.constant 0 : i32
    %c0_i32_0 = arith.constant 0 : i32
    %c0_i32_1 = arith.constant 0 : i32
    return %c0_i32, %c0_i32_0 : i32, i32
  }
  func.func @transform_5(%arg0: i32, %arg1: i32) -> (i32, i32) {
    %c0_i32 = arith.constant 0 : i32
    %c0_i32_0 = arith.constant 0 : i32
    %c0_i32_1 = arith.constant 0 : i32
    return %c0_i32, %c0_i32_0 : i32, i32
  }
  func.func @transform_6(%arg0: i32, %arg1: i32) -> (i32, i32, i32) {
    %c0_i32 = arith.constant 0 : i32
    %c0_i32_0 = arith.constant 0 : i32
    return %arg0, %c0_i32, %arg1 : i32, i32, i32
  }
}

</mosaic_0001>

<bundles_post_ra>
// kernel: tpu_custom_call.1
= control target key start
LH: loop header
LB: loop body
LE: loop exit
PB: predicated region body
PF: predicated region fallthrough
CT: control target
= control target key end

     0   :  { %s1856_s0 = inlined_call_operand.vmem [shape: bf16[2,8,256], index: 0, kind: input, shape index: {}]   ;;  %s1857_s1 = inlined_call_operand.vmem [shape: bf16[2,8,16], index: 1, kind: input, shape index: {}]   ;;  %s1858_s2 = inlined_call_operand.vmem [shape: bf16[128,8], index: 2, kind: input, shape index: {}]   ;;  %s1859_s3 = inlined_call_operand.vmem [shape: bf16[16,256], index: 3, kind: input, shape index: {}]   ;;  %s1860_s4 = inlined_call_operand.vmem [shape: bf16[8,128], index: 4, kind: input, shape index: {}]   ;;  %s1861_s5 = inlined_call_operand.vmem [shape: f32[8,1], index: 5, kind: input, shape index: {}]   ;;  %s1862_s6 = inlined_call_operand.hbm [shape: f32[2,8,256], index: 6, kind: output, shape index: {}]  }
   0x1   :  { %1865 = sst [smem:[#allocation7_spill]] %s1859_s3 }
   0x2   :  { %11 = vsyncpa [#allocation3], 0 }
   0x3   :  { %13 = vsyncpa [#allocation3 + $0x1], 0  ;;  %s1616_s21 = smov 0   ;;  %s1618_s22 = smov 0  }
   0x4   :  { %s1620_s23 = smov 0   ;;  %s1622_s24 = smov 0  }
   0x5   :  { %s1624_s25 = smov 0   ;;  %s1626_s26 = smov 0  }
   0x6   :  { %s1628_s27 = smov 0   ;;  %s1630_s28 = smov 0  }
   0x7 LB: > { %s1195_s29 = sadd.s32 4294967295, %s1568_s28   ;;  %s1196_s30 = sadd.s32 4294967294, %s1568_s28   ;;  %s1568_s28 = sphi %s1630_s28, %s19_s28   ;;  %s1564_s27 = sphi %s1628_s27, %s1879_s27   ;;  %s1560_s26 = sphi %s1626_s26, %s1878_s26   ;;  %s1556_s25 = sphi %s1624_s25, %s1877_s25   ;;  %s1552_s24 = sphi %s1622_s24, %s1876_s24   ;;  %s1548_s23 = sphi %s1620_s23, %s1875_s23   ;;  %s1544_s22 = sphi %s1618_s22, %s1874_s22   ;;  %s1540_s21 = sphi %s1616_s21, %s1873_s21  }
   0x8   : > { %s28_s7 = sadd.s32 1, %s1560_s26  ;;  %s31_s8 = sadd.s32 1, %s1564_s27 }
   0x9   : > { %p29_p0 = scmp.ge.s32.totalorder %s28_s7, 2  ;;  %p188_p1 = scmp.ne.s32.totalorder %s1548_s23, %s1544_s22 }
   0xa   : > { %p189_p2 = scmp.eq.s32.totalorder %s1195_s29, 3  ;;  %p194_p5 = scmp.ne.s32.totalorder %s1544_s22, %s1540_s21 }
   0xb   : > { %s1881_s7 = smov (%p29_p0, %s28_s7), 0  ;;  %s1883_s8 = smov (!%p29_p0, %s31_s8), %s1564_s27 }
   0xc   : > { %1866 = sst [smem:[#allocation5_spill]] %s1881_s7  ;;  %s174_s9 = ssub.s32 %s1560_s26, %s1881_s7 }
   0xd   : > { %p1667_p3 = por %p189_p2, %p188_p1  ;;  %p33_p4 = scmp.ge.s32.totalorder %s1883_s8, 2 }
   0xe   : > { %p195_p6 = scmp.eq.s32.totalorder %s1196_s30, 3  ;;  %p1199_p7 = scmp.ge.s32.totalorder %s1568_s28, 1 }
   0xf   : > { %s1885_s8 = smov (%p33_p4, %s1883_s8), 0  ;;  %p243_p9 = scmp.lt.s32.totalorder %s1568_s28, 5 }
  0x10   : > { %1868 = sst [smem:[#allocation6_spill]] %s1885_s8  ;;  %p1676_p8 = por %p195_p6, %p194_p5 }
  0x11   : > { %s173_s12 = ssub.s32 %s1564_s27, %s1885_s8  ;;  %s178_s13 = sadd.s32 1, %s1548_s23 }
  0x12   : > { %s175_s14 = sor.u32 %s174_s9, %s173_s12  ;;  %p244_p10 = pnand %p1199_p7, %p243_p9 }
  0x13   : > { %p176_p11 = scmp.eq.s32.totalorder %s175_s14, 0  ;;  %s1870_s3 = sld [smem:[#allocation7_spill]] (!%p244_p10)  ;;  %v1570_v2 = vmov (!%p244_p10), 0   ;;  %v1449_v3 = vld [vmem:[%s1858_s2] sm:$0xff] (!%p244_p10)   ;;  %vm352_vm0 = vcmask (!%p244_p10), 64512   ;;  %vm498_vm1 = vcmask (!%p244_p10), 130048  }
  0x14   : > { %247 = sbr.rel (%p244_p10) target bundleno = 942 (0x3ae), region = 44  ;;  %p280_p12 = scmp.lt.s32.totalorder (!%p244_p10), %s1556_s25, 1  ;;  %534 = vmatprep.mubr.bf16.mxu1 (!%p244_p10), %v1570_v2  ;;  %1445 = vset.pattern.permute.xlu0 (!%p244_p10), %v1570_v2  ;;  %vm377_vm2 = vcmask (!%p244_p10), 1043456   ;;  %v1450_v7 = vld [vmem:[%s1858_s2 + $0x8] sm:$0xff] (!%p244_p10)   ;;  %v1451_v8 = vld [vmem:[%s1858_s2 + $0x10] sm:$0xff] (!%p244_p10)   ;;  %v1452_v9 = vld [vmem:[%s1858_s2 + $0x18] sm:$0xff] (!%p244_p10)  }
  0x15   : > { %s1685_s15 = scalar_select %p176_p11, %s1548_s23, %s178_s13  }
  0x16   : > { %p282_p13 = scmp.lt.s32.totalorder (!%p244_p10), %s1552_s24, 1  ;;  %1274 = vmatprep.mubr.msk.bf16.mxu0 (!%p244_p10), %vm352_vm0, %v1449_v3  ;;  %v1453_v10 = vld [vmem:[%s1858_s2 + $0x20] sm:$0xff] (!%p244_p10)   ;;  %v1454_v11 = vld [vmem:[%s1858_s2 + $0x28] sm:$0xff] (!%p244_p10)   ;;  %v1455_v12 = vld [vmem:[%s1858_s2 + $0x30] sm:$0xff] (!%p244_p10)   ;;  %v1571_v14 = vmov (!%p244_p10), 0.0   ;;  %vm1572_vm3 = vmmov (!%p244_p10), 0  }
  0x17   : > { %v1456_v13 = vld [vmem:[%s1858_s2 + $0x38] sm:$0xff] (!%p244_p10)   ;;  %v295_v17 = vld [vmem:[%s1860_s4] sm:$0xf] (!%p244_p10)  ;;  %vm545_vm4 = vcmask (!%p244_p10), 261120   ;;  %s1579_s8 = smov (!%p244_p10), 24   ;;  %vm1007_vm5 = vcmask (!%p244_p10), 195584  }
  0x18   : > { %v1226_v21 = vcombine.low (!%p244_p10), %v295_v17, %v295_v17  ;;  %s277_s16 = sand.u32 (!%p244_p10), 1, %s1544_s22  }
  0x19   : > { %v1446_v0 = vld [vmem:[%s1870_s3 + $0x4] ss:$8 sps:$4 sm:$0xff] (!%p244_p10)   ;;  %v1448_v1 = vld [vmem:[%s1870_s3] ss:$8 sps:$4 sm:$0xff] (!%p244_p10)  }
  0x1a   : > { %502 = vmatprep.subr.bf16.mxu1 (!%p244_p10), %v1446_v0  ;;  %v1576_v0 = vmov (!%p244_p10), 0.0|0.0  }
  0x1b   : > { %s281_s30 = scalar_select %p280_p12, %s1556_s25, 1  ;;  %503 = vmatpush1.bf16.msra.mxu1 %v1448_v1 }
  0x1c   : > { %s283_s9 = scalar_select %p282_p13, %s1552_s24, 1  ;;  %1290 = vmatprep.subr.bf16.mxu1 %v1571_v14 }
  0x1d   : > { %s1203_s12 = sshll.u32 %s281_s30, 2  ;;  %s1201_s13 = sshll.u32 %s281_s30, 1 }
  0x1e   : > { %s291_s17 = scalar_lea.vmem %s1857_s1, %s1203_s12  ;;  %s285_s18 = sadd.s32 %s1201_s13, %s283_s9 }
  0x1f   : > { %v294_v4 = vld [vmem:[%s291_s17] sm:$0xf]  ;;  %s1202_s19 = sshll.u32 %s285_s18, 2  ;;  %s1573_s30 = smov 64  }
  0x20   : > { %1222 = vmatmul.mubr.msk.bf16.vlgmr.msra.gmra.mrb[0].mxu1 %vm498_vm1, %v294_v4  ;;  %s287_s3 = scalar_lea.vmem %s1856_s0, %s1202_s19  ;;  %s1574_s12 = smov 96  }
  0x21   : > { %v293_v5 = vld [vmem:[%s287_s3] sm:$0xf]  ;;  %1294 = vmatprep.mubr.msk.bf16.mxu1 %vm1572_vm3, %v1571_v14  ;;  %s1575_s9 = smov 32   ;;  %s1577_s13 = smov 8  }
  0x22   : > { %1363 = vmatprep.subr.msk.bf16.mxu0 %vm377_vm2, %v293_v5  ;;  %v379_v6 = vsel %vm377_vm2, %v293_v5, 0  ;;  %s1578_s3 = smov 16   ;;  %s1200_s17 = sshll.u32 %s277_s16, 3 }
  0x23   : > { %1273 = vmatpush3.bf16.msra.mxu0 %v379_v6  ;;  %s1234_s18 = sshll.u32 %s1556_s25, 1  ;;  %s279_s29 = scalar_lea.vmem [#allocation2], %s1200_s17 }
  0x24   : > { %1312 = vmatprep.subr.bf16.mxu0 %v1571_v14  ;;  %s1101_s19 = sadd.s32 %s1552_s24, %s1234_s18  ;;  %s1090_s25 = scalar_lea.sflag [#allocation3], %s277_s16 }
  0x25   : > { %s1235_s20 = sshll.u32 %s1101_s19, 7 }
  0x26   : > { %1275 = vmatmul.mubr.msk.bf16.vlgmr.msra.gmra.mrb[0].mxu0 %vm352_vm0, %v1450_v7 }
  0x27   : > { %1278 = vmatprep.mubr.msk.bf16.mxu0 %vm352_vm0, %v1451_v8 }
  0x2e   : > { %1279 = vmatmul.mubr.msk.bf16.gmra.mrb[4].mxu0 %vm352_vm0, %v1452_v9 }
  0x2f   : > { %1282 = vmatprep.mubr.msk.bf16.mxu0 %vm352_vm0, %v1453_v10 }
  0x36   : > { %1283 = vmatmul.mubr.msk.bf16.gmra.mrb[8].mxu0 %vm352_vm0, %v1454_v11 }
  0x37   : > { %1286 = vmatprep.mubr.msk.bf16.mxu0 %vm352_vm0, %v1455_v12 }
  0x3e   : > { %1287 = vmatmul.mubr.msk.bf16.gmra.mrb[12].mxu0 %vm352_vm0, %v1456_v13 }
  0x3f   : > { %1314 = vmatprep.mubr.msk.bf16.mxu0 %vm1572_vm3, %v1571_v14 }
  0xf3   : > { %v536_v15 = vpop.f32.mrb[0].mxu1 }
  0xf4   : > { %v538_v16 = vpop.f32.mrb[1].mxu1  ;;  %v543_v22 = vpack.c.bf16 %v536_v15, %v536_v15 }
  0xf5   : > { %v544_v18 = vpack.c.bf16 %v538_v16, %v538_v16  ;;  %v540_v19 = vpop.f32.mrb[2].mxu1 }
  0xf6   : > { %v541_v20 = vpop.f32.mrb[3].mxu1 }
  0xf7   : > { %833 = vrot.lane.b32.xlu1 %v544_v18, %s1573_s30  ;;  %721 = vrot.lane.b32.xlu0 %v544_v18, %s1574_s12  ;;  %v610_v38 = vsel %vm545_vm4, %v544_v18, 0 }
  0xf9   : > { %v1276_v23 = vpop.f32.mrb[0].mxu0 }
  0xfa   : > { %v415_v24 = vpop.f32.mrb[1].mxu0 }
  0xfb   : > { %653 = vrot.lane.b32.xlu1 %v543_v22, %s1574_s12  ;;  %718 = vrot.lane.b32.xlu0 %v1226_v21, %s1574_s12  ;;  %v1277_v25 = vpop.f32.mrb[2].mxu0 }
  0xfc   : > { %v479_v26 = vpack.c.bf16 %v1277_v25, %v1276_v23  ;;  %v418_v27 = vpop.f32.mrb[3].mxu0 }
  0xfd   : > { %v478_v28 = vpack.c.bf16 %v418_v27, %v415_v24 }
  0xff   : > { %945 = vrot.lane.b32.xlu1 %v544_v18, %s1575_s9  ;;  %831 = vrot.lane.b32.xlu0 %v1226_v21, %s1573_s30 }
 0x100   : > { %1291 = vmatpush3.bf16.msra.mxu1 %v478_v28 }
 0x101   : > { %1292 = vmatprep.subr.bf16.mxu1 %v1571_v14  ;;  %v1280_v29 = vpop.f32.mrb[4].mxu0 }
 0x102   : > { %v431_v30 = vpop.f32.mrb[5].mxu0 }
 0x103   : > { %769 = vrot.lane.b32.xlu0 %v543_v22, %s1573_s30  ;;  %943 = vrot.lane.b32.xlu1 %v1226_v21, %s1575_s9  ;;  %v1281_v31 = vpop.f32.mrb[6].mxu0  ;;  %s1105_s30 = sshll.u32 %s279_s29, 4  ;;  %s1805_s30 = int_to_ptr.vmem [resolvable:$true] %s1105_s30 }
 0x104   : > { %1293 = vmatpush3.bf16.msra.mxu1 %v479_v26  ;;  %v481_v32 = vpack.c.bf16 %v1281_v31, %v1280_v29  ;;  %v434_v33 = vpop.f32.mrb[7].mxu0  ;;  %s1474_s24 = scalar_lea.vmem %s1805_s30, 128 }
 0x105   : > { %1298 = vmatprep.subr.bf16.mxu1 %v1571_v14  ;;  %v480_v34 = vpack.c.bf16 %v434_v33, %v431_v30  ;;  %p1475_p0 = scmp.ne.s32.totalorder %s1805_s30, %s1474_s24 }
 0x107   : > { %1295 = vmatmul.mubr.msk.bf16.vlgmr.msra.gmra.mrb[4].mxu1 %vm545_vm4, %v543_v22  ;;  %881 = vrot.lane.b32.xlu0 %v543_v22, %s1575_s9  ;;  %p1476_p1 = pnand %p1475_p0, %p1667_p3 }
 0x108   : > { %1300 = vmatprep.mubr.msk.bf16.mxu1 %vm1572_vm3, %v1571_v14 }
 0x109   : > { %v1284_v35 = vpop.f32.mrb[8].mxu0  ;;  %p1477_p2 = pneg %p1476_p1 }
 0x10a   : > { %v447_v36 = vpop.f32.mrb[9].mxu0 }
 0x10b   : > { %v1285_v37 = vpop.f32.mrb[10].mxu0 }
 0x10c   : > { %v483_v39 = vpack.c.bf16 %v1285_v37, %v1284_v35  ;;  %v450_v40 = vpop.f32.mrb[11].mxu0 }
 0x10d   : > { %1299 = vmatpush3.bf16.xpose.msra.mxu1 %v610_v38  ;;  %v482_v41 = vpack.c.bf16 %v450_v40, %v447_v36  ;;  %v1009_v40 = vld [vmem:[%s1861_s5] sm:$0xff] }
 0x10e   : > { %1304 = vmatprep.subr.bf16.mxu1 %v1571_v14 }
 0x111   : > { %v1288_v42 = vpop.f32.mrb[12].mxu0 }
 0x112   : > { %v463_v43 = vpop.f32.mrb[13].mxu0 }
 0x113   : > { %v1289_v44 = vpop.f32.mrb[14].mxu0 }
 0x114   : > { %1301 = vmatmul.mubr.msk.bf16.vlgmr.msra.gmra.mrb[8].mxu1 %vm545_vm4, %v295_v17  ;;  %v485_v45 = vpack.c.bf16 %v1289_v44, %v1288_v42  ;;  %v466_v46 = vpop.f32.mrb[15].mxu0 }
 0x115   : > { %1305 = vmatpush3.bf16.msra.mxu1 %v480_v34  ;;  %1308 = vmatprep.mubr.msk.bf16.mxu1 %vm1572_vm3, %v1571_v14  ;;  %v484_v47 = vpack.c.bf16 %v466_v46, %v463_v43 }
 0x116   : > { %1306 = vmatprep.subr.bf16.mxu1 %v1571_v14 }
 0x119   : > { %1307 = vmatpush3.bf16.msra.mxu1 %v481_v32 }
 0x11a   : > { %1318 = vmatprep.subr.bf16.mxu1 %v1571_v14 }
 0x169   : > { %v834_v48 = vpop.permute.xlu1 %833  ;;  %v722_v49 = vpop.permute.xlu0 %721 }
 0x16a   : > { %v727_v50 = vsel %vm545_vm4, %v722_v49, 0  ;;  %v839_v54 = vsel %vm545_vm4, %v834_v48, 0 }
 0x16b   : > { %1313 = vmatpush3.bf16.xpose.msra.mxu0 %v727_v50 }
 0x16c   : > { %1326 = vmatprep.subr.bf16.mxu0 %v1571_v14 }
 0x16d   : > { %v654_v51 = vpop.permute.xlu1 %653  ;;  %v719_v52 = vpop.permute.xlu0 %718 }
 0x16e   : > { %1309 = vmatmul.mubr.msk.bf16.vlgmr.msra.gmra.mrb[12].mxu1 %vm545_vm4, %v654_v51 }
 0x16f   : > { %1319 = vmatpush3.bf16.msra.mxu1 %v482_v41  ;;  %1322 = vmatprep.mubr.msk.bf16.mxu1 %vm1572_vm3, %v1571_v14 }
 0x170   : > { %1320 = vmatprep.subr.bf16.mxu1 %v1571_v14 }
 0x171   : > { %v832_v53 = vpop.permute.xlu0 %831  ;;  %v946_v56 = vpop.permute.xlu1 %945 }
 0x172   : > { %1315 = vmatmul.mubr.msk.bf16.vlgmr.msra.gmra.mrb[16].mxu0 %vm545_vm4, %v719_v52  ;;  %v951_v57 = vsel %vm545_vm4, %v946_v56, 0 }
 0x173   : > { %1321 = vmatpush3.bf16.msra.mxu1 %v483_v39  ;;  %1327 = vmatpush3.bf16.xpose.msra.mxu0 %v839_v54 }
 0x174   : > { %1332 = vmatprep.subr.bf16.mxu1 %v1571_v14  ;;  %1328 = vmatprep.mubr.msk.bf16.mxu0 %vm1572_vm3, %v1571_v14 }
 0x175   : > { %v770_v55 = vpop.permute.xlu0 %769  ;;  %1340 = vmatprep.subr.bf16.mxu0 %v1571_v14  ;;  %v944_v59 = vpop.permute.xlu1 %943 }
 0x176   : > { %1323 = vmatmul.mubr.msk.bf16.vlgmr.msra.gmra.mrb[16].mxu1 %vm545_vm4, %v770_v55 }
 0x177   : > { %1333 = vmatpush3.bf16.msra.mxu1 %v484_v47  ;;  %1336 = vmatprep.mubr.msk.bf16.mxu1 %vm1572_vm3, %v1571_v14 }
 0x178   : > { %1334 = vmatprep.subr.bf16.mxu1 %v1571_v14 }
 0x179   : > { %v882_v58 = vpop.permute.xlu0 %881 }
 0x17a   : > { %1329 = vmatmul.mubr.msk.bf16.vlgmr.msra.gmra.mrb[20].mxu0 %vm545_vm4, %v832_v53 }
 0x17b   : > { %1335 = vmatpush3.bf16.msra.mxu1 %v485_v45  ;;  %1341 = vmatpush3.bf16.xpose.msra.mxu0 %v951_v57 }
 0x17c   : > { %1342 = vmatprep.mubr.msk.bf16.mxu0 %vm1572_vm3, %v1571_v14  ;;  %1357 = vmatprep.subr.bf16.mxu1 %v1576_v0 }
 0x17e   : > { %1337 = vmatmul.mubr.msk.bf16.vlgmr.msra.gmra.mrb[20].mxu1 %vm545_vm4, %v882_v58 }
 0x17f   : > { %1354 = vmatprep.mubr.msk.f32.mxu1 %vm1572_vm3, %v1571_v14 }
 0x182   : > { %1343 = vmatmul.mubr.msk.bf16.vlgmr.msra.gmra.mrb[24].mxu0 %vm545_vm4, %v944_v59 }
 0x1da   : > { %v583_v60 = vpop.f32.mrb[4].mxu1 }
 0x1db   : > { %v1296_v61 = vpop.f32.mrb[5].mxu1  ;;  %v589_v5 = vrot.slane %v583_v60, 4 }
 0x1dc   : > { %v586_v62 = vpop.f32.mrb[6].mxu1 }
 0x1dd   : > { %v1297_v63 = vpop.f32.mrb[7].mxu1  ;;  %v590_v6 = vmax.f32 %v583_v60, %v589_v5 }
 0x1df   : > { %v591_v7 = vrot.slane %v590_v6, 2 }
 0x1e1   : > { %v592_v8 = vmax.f32 %v590_v6, %v591_v7 }
 0x1e3   : > { %v593_v9 = vrot.slane %v592_v8, 1 }
 0x1e5   : > { %v594_v10 = vmax.f32 %v592_v8, %v593_v9 }
 0x1e7   : > { %v1782_v1 = vpop.f32.mrb[8].mxu1  ;;  %v595_v11 = vsub.f32 %v583_v60, %v594_v10 }
 0x1e8   : > { %v1302_v2 = vpop.f32.mrb[9].mxu1 }
 0x1e9   : > { %v649_v3 = vpop.f32.mrb[10].mxu1  ;;  %v596_v12 = vmul.f32 1.442695, %v595_v11 }
 0x1ea   : > { %v1303_v4 = vpop.f32.mrb[11].mxu1 }
 0x1eb   : > { %1458 = vpow2.f32 %v596_v12 }
 0x1f5   : > { %v1784_v30 = vpop.eup %1458 }
 0x1f6   : > { %v598_v39 = vrot.slane %v1784_v30, 4 }
 0x1f8   : > { %v599_v49 = vadd.f32 %v1784_v30, %v598_v39 }
 0x1fa   : > { %v600_v58 = vrot.slane %v599_v49, 2 }
 0x1fc   : > { %v601_v63 = vadd.f32 %v600_v58, %v599_v49 }
 0x1fe   : > { %v602_v6 = vrot.slane %v601_v63, 1 }
 0x200   : > { %v603_v10 = vadd.f32 %v602_v6, %v601_v63 }
 0x241   : > { %v692_v13 = vpop.f32.mrb[12].mxu1 }
 0x242   : > { %v698_v14 = vrot.slane %v692_v13, 4  ;;  %v1310_v15 = vpop.f32.mrb[13].mxu1 }
 0x243   : > { %v695_v16 = vpop.f32.mrb[14].mxu1 }
 0x244   : > { %v699_v17 = vmax.f32 %v692_v13, %v698_v14  ;;  %v1311_v18 = vpop.f32.mrb[15].mxu1 }
 0x245   : > { %v763_v19 = vpop.f32.mrb[16].mxu0 }
 0x246   : > { %v700_v20 = vrot.slane %v699_v17, 2  ;;  %994 = vrot.lane.b32.xlu1 %v763_v19, %s1577_s13  ;;  %v1316_v21 = vpop.f32.mrb[17].mxu0  ;;  %s1803_s13 = scalar_lea.hbm %s1862_s6, %s1235_s20 }
 0x247   : > { %v766_v22 = vpop.f32.mrb[18].mxu0 }
 0x248   : > { %v701_v23 = vmax.f32 %v699_v17, %v700_v20  ;;  %v1317_v24 = vpop.f32.mrb[19].mxu0 }
 0x249   : > { %v808_v25 = vpop.f32.mrb[16].mxu1 }
 0x24a   : > { %v702_v26 = vrot.slane %v701_v23, 1  ;;  %v814_v27 = vrot.slane %v808_v25, 4  ;;  %v1324_v28 = vpop.f32.mrb[17].mxu1 }
 0x24b   : > { %v811_v29 = vpop.f32.mrb[18].mxu1 }
 0x24c   : > { %v703_v31 = vmax.f32 %v701_v23, %v702_v26  ;;  %v815_v32 = vmax.f32 %v808_v25, %v814_v27  ;;  %v1325_v33 = vpop.f32.mrb[19].mxu1 }
 0x24d   : > { %v875_v34 = vpop.f32.mrb[20].mxu0 }
 0x24e   : > { %v704_v35 = vsub.f32 %v692_v13, %v703_v31  ;;  %v816_v36 = vrot.slane %v815_v32, 2  ;;  %998 = vrot.lane.b32.xlu0 %v875_v34, %s1578_s3  ;;  %v1330_v37 = vpop.f32.mrb[21].mxu0  ;;  %s1580_s3 = smov [#allocation2]  }
 0x24f   : > { %v878_v38 = vpop.f32.mrb[22].mxu0  ;;  %s1478_s14 = sshll.u32 %s1580_s3, 4  ;;  %s1479_s14 = int_to_ptr.vmem [resolvable:$false] %s1478_s14 }
 0x250   : > { %v705_v41 = vmul.f32 1.442695, %v704_v35  ;;  %v817_v42 = vmax.f32 %v815_v32, %v816_v36  ;;  %v1331_v43 = vpop.f32.mrb[23].mxu0  ;;  %s1480_s7 = scalar_lea.vmem %s1479_s14, 256  ;;  %p1481_p4 = scmp.lt.s32.totalorder %s1805_s30, %s1479_s14 }
 0x251   : > { %v920_v44 = vpop.f32.mrb[20].mxu1  ;;  %p1482_p5 = scmp.lt.s32.totalorder %s1480_s7, %s1474_s24 }
 0x252   : > { %1460 = vpow2.f32 %v705_v41  ;;  %v818_v45 = vrot.slane %v817_v42, 1  ;;  %v926_v46 = vrot.slane %v920_v44, 4  ;;  %v1338_v47 = vpop.f32.mrb[21].mxu1  ;;  %1012 = vperm.xlu0 %1445, %v1009_v40  }
 0x253   : > { %v923_v48 = vpop.f32.mrb[22].mxu1  ;;  %p1483_p6 = por %p1482_p5, %p1481_p4 }
 0x254   : > { %v819_v50 = vmax.f32 %v817_v42, %v818_v45  ;;  %v927_v51 = vmax.f32 %v920_v44, %v926_v46  ;;  %v1339_v52 = vpop.f32.mrb[23].mxu1 }
 0x255   : > { %v987_v53 = vpop.f32.mrb[24].mxu0  ;;  %p1484_p7 = pnand %p1483_p6, %p1477_p2 }
 0x256   : > { %v820_v54 = vsub.f32 %v808_v25, %v819_v50  ;;  %v928_v55 = vrot.slane %v927_v51, 2  ;;  %1002 = vrot.lane.b32.xlu1 %v987_v53, %s1579_s8  ;;  %v1344_v56 = vpop.f32.mrb[25].mxu0 }
 0x257   : > { %v990_v57 = vpop.f32.mrb[26].mxu0 }
 0x258   : > { %v821_v59 = vmul.f32 1.442695, %v820_v54  ;;  %v929_v60 = vmax.f32 %v927_v51, %v928_v55  ;;  %v1345_v61 = vpop.f32.mrb[27].mxu0 }
 0x25a   : > { %1462 = vpow2.f32 %v821_v59  ;;  %v930_v62 = vrot.slane %v929_v60, 1 }
 0x25c   : > { %v1461_v2 = vpop.eup %1460  ;;  %v931_v3 = vmax.f32 %v929_v60, %v930_v62 }
 0x25d   : > { %v707_v4 = vrot.slane %v1461_v2, 4 }
 0x25e   : > { %v932_v5 = vsub.f32 %v920_v44, %v931_v3 }
 0x25f   : > { %v708_v7 = vadd.f32 %v1461_v2, %v707_v4 }
 0x260   : > { %v933_v8 = vmul.f32 1.442695, %v932_v5 }
 0x261   : > { %v709_v9 = vrot.slane %v708_v7, 2 }
 0x262   : > { %1464 = vpow2.f32 %v933_v8 }
 0x263   : > { %v710_v11 = vadd.f32 %v709_v9, %v708_v7  ;;  %1466 = vrcp.f32 %v603_v10 }
 0x264   : > { %v1463_v12 = vpop.eup %1462 }
 0x265   : > { %v711_v13 = vrot.slane %v710_v11, 1  ;;  %v823_v14 = vrot.slane %v1463_v12, 4 }
 0x267   : > { %v712_v15 = vadd.f32 %v711_v13, %v710_v11  ;;  %v824_v16 = vadd.f32 %v1463_v12, %v823_v14 }
 0x269   : > { %1468 = vrcp.f32 %v712_v15  ;;  %v825_v17 = vrot.slane %v824_v16, 2 }
 0x26b   : > { %v826_v18 = vadd.f32 %v825_v17, %v824_v16 }
 0x26c   : > { %v1465_v19 = vpop.eup %1464 }
 0x26d   : > { %v935_v20 = vrot.slane %v1465_v19, 4  ;;  %v827_v21 = vrot.slane %v826_v18, 1  ;;  %v1467_v23 = vpop.eup %1466 }
 0x26e   : > { %v605_v28 = vmul.f32 %v1467_v23, %v1784_v30 }
 0x26f   : > { %v936_v22 = vadd.f32 %v1465_v19, %v935_v20  ;;  %v828_v26 = vadd.f32 %v827_v21, %v826_v18 }
 0x271   : > { %v937_v24 = vrot.slane %v936_v22, 2  ;;  %1470 = vrcp.f32 %v828_v26 }
 0x273   : > { %v1469_v25 = vpop.eup %1468  ;;  %v938_v27 = vadd.f32 %v937_v24, %v936_v22 }
 0x274   : > { %v714_v29 = vmul.f32 %v1469_v25, %v1461_v2 }
 0x275   : > { %v939_v31 = vrot.slane %v938_v27, 1 }
 0x276   : > { %v1358_v32 = vpack.c.bf16 %v714_v29, %v605_v28 }
 0x277   : > { %v940_v33 = vadd.f32 %v939_v31, %v938_v27 }
 0x278   : > { %1359 = vmatpush3.bf16.msra.mxu1 %v1358_v32 }
 0x279   : > { %1360 = vmatprep.subr.bf16.mxu1 %v1576_v0  ;;  %1472 = vrcp.f32 %v940_v33 }
 0x27b   : > { %v1471_v34 = vpop.eup %1470 }
 0x27c   : > { %v830_v36 = vmul.f32 %v1471_v34, %v1463_v12 }
 0x283   : > { %v1473_v35 = vpop.eup %1472 }
 0x284   : > { %v942_v37 = vmul.f32 %v1473_v35, %v1465_v19 }
 0x286   : > { %v1361_v38 = vpack.c.bf16 %v942_v37, %v830_v36 }
 0x288   : > { %1362 = vmatpush3.bf16.msra.mxu1 %v1361_v38 }
 0x2b8   : > { %v995_v39 = vpop.permute.xlu1 %994 }
 0x2b9   : > { %v1005_v40 = vsel %vm352_vm0, %v1782_v1, %v995_v39 }
 0x2c0   : > { %v999_v30 = vpop.permute.xlu0 %998 }
 0x2c1   : > { %v1006_v41 = vsel %vm498_vm1, %v1005_v40, %v999_v30 }
 0x2c8   : > { %v1003_v42 = vpop.permute.xlu1 %1002 }
 0x2c9   : > { %v1008_v0 = vsel %vm1007_vm5, %v1006_v41, %v1003_v42 }
 0x2ca   : > { %1355 = vmatmul.mubr.msk.f32.vlgmr.msra.gmra.mrb[24].mxu1 %vm545_vm4, %v1008_v0 }
 0x2d1   : > { %v1013_v43 = vpop.permute.xlu0 %1012 }
 0x39d   : > { %v1084_v44 = vpop.f32.mrb[24].mxu1 }
 0x39e   : > { %v1085_v45 = vadd.f32 %v1084_v44, %v1013_v43  ;;  %v1356_v46 = vpop.f32.mrb[25].mxu1 }
 0x3a0   : > { %1088 = vst [vmem:[%s279_s29] sm:$0xff] %v1085_v45 }
 0x3a1   : > { %1487 = shalt.err (!%p1484_p7)
}
 0x3a2   : > { %s1488_s8 = scalar_lea.hbm %s1803_s13, 128  ;;  %s1492_s18 = scalar_lea.hbm %s1862_s6, 512 }
 0x3a3   : > { %p1489_p9 = scmp.ne.s32.totalorder %s1803_s13, %s1488_s8  ;;  %p1493_p12 = scmp.lt.u32.totalorder %s1803_s13, %s1862_s6 }
 0x3a4   : > { %p1494_p13 = scmp.lt.u32.totalorder %s1492_s18, %s1488_s8  ;;  %p1496_p1 = scmp.lt.u32.totalorder %s1488_s8, %s1803_s13 }
 0x3a5   : > { %p1490_p10 = pnand %p1489_p9, %p1667_p3 }
 0x3a6   : > { %p1495_p0 = por %p1494_p13, %p1493_p12 }
 0x3a7   : > { %p1491_p11 = pneg %p1490_p10 }
 0x3a8   : > { %p1497_p2 = por %p1496_p1, %p1495_p0 }
 0x3aa   : > { %p1498_p4 = pnand %p1497_p2, %p1491_p11 }
 0x3ac   : > { %1501 = shalt.err (!%p1498_p4)
}
 0x3ad   : > { %1364 = dma.vmem_to_hbm [thread:$0]  (%p1667_p3), %s1805_s30, 128, %s1803_s13, %s1090_s25  }
 0x3ae PF: > { %p1370_p5 = scmp.ge.s32.totalorder %s1568_s28, 2  ;;  %s1117_s29 = sand.u32 1, %s1540_s21  }
 0x3af   : > { %s1118_s12 = scalar_lea.sflag [#allocation3], %s1117_s29 }
 0x3b0   : > { %p1367_p6 = pnand %p1370_p5, %p1676_p8 }
 0x3b2   : > { %1535 = dma.done.wait (!%p1367_p6), %s1118_s12, 128  }
 0x3b3   : > { %1537 = vsyncadd (!%p1367_p6), %s1118_s12, 4294967168  ;;  %s19_s28 = sadd.s32 1, %s1568_s28   ;;  %s1871_s10 = sld [smem:[#allocation5_spill]] }
 0x3b4   : > { %p16_p7 = scmp.ge.s32.totalorder %s19_s28, 6   ;;  %s1872_s30 = sld [smem:[#allocation6_spill]] }
 0x3b5   : > { %s1873_s21 = smov %s1544_s22  ;;  %s1874_s22 = smov %s1548_s23 }
 0x3b6   : > { %s1875_s23 = smov %s1685_s15  ;;  %s1876_s24 = smov %s1560_s26 }
 0x3b7   : > { %s1877_s25 = smov %s1564_s27  ;;  %18 = sbr.rel (!%p16_p7) target bundleno = 7 (0x7), region = 82 }
 0x3b9   : > { %s1878_s26 = smov %s1871_s10 }
 0x3ba   : > { %s1879_s27 = smov %s1872_s30 }
 0x3be   :  { %1123 = vsyncpa [#allocation3], 1 }
 0x3bf   :  { %1125 = vsyncpa [#allocation3 + $0x1], 1 }

</bundles_post_ra>
